<compile_context>
chip_gen: v7x
topology: tpu7x:2x2x1
jax: 0.10.0
libtpu: 0.0.40
codegen_flags: <defaults>
</compile_context>

<pallas_src>
import jax
import jax.numpy as jnp
from jax import lax
from jax.experimental import pallas as pl
from jax.experimental.pallas import tpu as pltpu


def _round_up(x, m):
    return ((x + m - 1) // m) * m


def _make_kernel(chunk, num_chunks, compute_dtype):
    """Per-tile kernel. x tile is (Cin, TN) channel-major (pixels on lanes);
    weights are small resident (Cout, Cin) arrays; biases are (Cout, 1)."""

    def kernel(x_ref, w1_ref, b1_ref, w2_ref, b2_ref, w3_ref, b3_ref, o_ref):
        w1 = w1_ref[...]
        b1 = b1_ref[...]
        w2 = w2_ref[...]
        b2 = b2_ref[...]
        w3 = w3_ref[...]
        b3 = b3_ref[...]

        def mlp(xb):
            # conv1 (1x1) + ReLU        (Dropout == identity, eval semantics)
            h1 = jnp.dot(w1, xb, preferred_element_type=jnp.float32)
            h1 = jnp.maximum(h1 + b1, 0.0).astype(compute_dtype)
            # conv2 (1x1) + ReLU
            h2 = jnp.dot(w2, h1, preferred_element_type=jnp.float32)
            h2 = jnp.maximum(h2 + b2, 0.0).astype(compute_dtype)
            # conv3 (1x1) -> logits
            o = jnp.dot(w3, h2, preferred_element_type=jnp.float32)
            return (o + b3).astype(o_ref.dtype)

        if num_chunks == 1:
            o_ref[...] = mlp(x_ref[...].astype(compute_dtype))
        else:
            # Big DMA tile, small compute chunk: h1/h2 VMEM temporaries stay
            # bounded (~0.75 MiB at chunk=2048) independent of tile_n.
            def body(c, carry):
                start = pl.multiple_of(c * chunk, chunk)
                xb = x_ref[:, pl.ds(start, chunk)].astype(compute_dtype)
                o_ref[:, pl.ds(start, chunk)] = mlp(xb)
                return carry

            lax.fori_loop(0, num_chunks, body, 0, unroll=True)

    return kernel


def classifier_mlp(x_chw, params, *, tile_n=16384, chunk_n=2048, use_bf16=False):
    """x_chw: (Cin, H, W).  Returns (class_dim, H, W) float32 logits."""
    w1, b1, w2, b2, w3, b3 = params
    c_in, h, w = x_chw.shape
    class_dim = w3.shape[0]
    n_pix = h * w

    # Channel-major (Cin, N): pure reshape, no transpose, no padding copy.
    x_cm = x_chw.reshape(c_in, n_pix)

    # bf16 MXU-input path (f32 accumulation preserved inside the kernel).
    compute_dtype = (
        jnp.bfloat16 if (use_bf16 or x_chw.dtype == jnp.bfloat16) else jnp.float32
    )
    if compute_dtype == jnp.bfloat16:
        w1, w2, w3 = (a.astype(jnp.bfloat16) for a in (w1, w2, w3))

    # --- Tile selection ----------------------------------------------------
    #  * lane-aligned (multiple of 128)
    #  * grid_n >= 2 whenever n_pix > 128 (v7x: 2 TensorCores share the
    #    'parallel' grid axis)
    #  * multiple of chunk_n when larger, so the inner compute loop divides
    #    the tile evenly.
    half = _round_up(pl.cdiv(n_pix, 2), 128)
    tile_n = max(128, min(int(tile_n), half))
    if tile_n > chunk_n:
        tile_n = (tile_n // chunk_n) * chunk_n
        chunk = chunk_n
    else:
        tile_n = _round_up(tile_n, 128)
        chunk = tile_n
    num_chunks = tile_n // chunk
    grid_n = pl.cdiv(n_pix, tile_n)  # ragged last block handled by Pallas

    weight_bytes = sum(
        int(a.size) * a.dtype.itemsize for a in (w1, b1, w2, b2, w3, b3)
    )
    x_itemsize = x_cm.dtype.itemsize

    cost = pl.CostEstimate(
        flops=2 * n_pix * (c_in * 32 + 32 * 64 + 64 * class_dim),
        transcendentals=0,
        bytes_accessed=n_pix * c_in * x_itemsize
        + n_pix * class_dim * 4
        + weight_bytes,
    )

    # Working set: double-buffered x + out tiles, compute-chunk temporaries,
    # resident weights.  Cap at 48 MiB (safe on v7x's 64 MiB per-TC VMEM).
    vmem_need = (
        2 * c_in * tile_n * x_itemsize
        + 2 * class_dim * tile_n * 4
        + (32 + 64) * chunk * 4
        + 2 * weight_bytes
    )
    vmem_limit = int(min(max(4 * vmem_need, 32 * 1024 * 1024), 48 * 1024 * 1024))

    kernel = _make_kernel(chunk, num_chunks, compute_dtype)

    out_cm = pl.pallas_call(
        kernel,
        out_shape=jax.ShapeDtypeStruct((class_dim, n_pix), jnp.float32),
        grid_spec=pltpu.PrefetchScalarGridSpec(
            num_scalar_prefetch=0,
            grid=(grid_n,),
            in_specs=[
                pl.BlockSpec((c_in, tile_n), lambda i: (0, i)),   # pixel tile
                pl.BlockSpec(w1.shape, lambda i: (0, 0)),         # weights stay
                pl.BlockSpec(b1.shape, lambda i: (0, 0)),         # resident
                pl.BlockSpec(w2.shape, lambda i: (0, 0)),         # (constant
                pl.BlockSpec(b2.shape, lambda i: (0, 0)),         #  block index
                pl.BlockSpec(w3.shape, lambda i: (0, 0)),         #  => no
                pl.BlockSpec(b3.shape, lambda i: (0, 0)),         #  re-DMA)
            ],
            out_specs=pl.BlockSpec((class_dim, tile_n), lambda i: (0, i)),
        ),
        compiler_params=pltpu.CompilerParams(
            dimension_semantics=("parallel",),
            vmem_limit_bytes=vmem_limit,
        ),
        cost_estimate=cost,
    )(x_cm, w1, b1, w2, b2, w3, b3)

    # Restore spatial shape (reshape only — no slice, no transpose).
    return out_cm.reshape(class_dim, h, w)


def init_params(key, feature_img_dim, class_dim):
    """Deterministic synthetic parameters.  Weights stored as (Cout, Cin) —
    PyTorch Conv2d weight (Cout, Cin, 1, 1) squeezed — so the kernel computes
    W @ x directly.  Biases stored as (Cout, 1) so they broadcast along the
    lane (pixel) axis."""
    k = jax.random.split(key, 6)
    dims = [(feature_img_dim, 32), (32, 64), (64, class_dim)]
    params = []
    for i, (cin, cout) in enumerate(dims):
        wgt = jax.random.normal(k[2 * i], (cout, cin), jnp.float32) * 0.1
        bia = jax.random.normal(k[2 * i + 1], (cout, 1), jnp.float32) * 0.01
        params += [wgt, bia]
    return tuple(params)


def _reference(x_chw, params):
    w1, b1, w2, b2, w3, b3 = params
    c_in, h, w = x_chw.shape
    x = x_chw.reshape(c_in, h * w)
    y = jnp.maximum(w1 @ x + b1, 0.0)
    y = jnp.maximum(w2 @ y + b2, 0.0)
    y = w3 @ y + b3
    return y.reshape(w3.shape[0], h, w)


if __name__ == "__main__":
    feature_img_dim, class_dim = 4, 8
    key = jax.random.PRNGKey(0)
    kx, kp = jax.random.split(key)
    params = init_params(kp, feature_img_dim, class_dim)

    # Case 1: lane-aligned pixel count (16x16 = 256), exact f32 path.
    x = jax.random.normal(kx, (feature_img_dim, 16, 16), jnp.float32)
    out = jax.block_until_ready(classifier_mlp(x, params))
    ref = _reference(x, params)
    assert out.shape == (class_dim, 16, 16)
    assert jnp.allclose(out, ref, atol=1e-5, rtol=1e-5)

    # Case 2: ragged pixel count (17x19 = 323) — exercises the masked last
    # block path with no wrapper-side pad or slice.
    x2 = jax.random.normal(kx, (feature_img_dim, 17, 19), jnp.float32)
    out2 = jax.block_until_ready(classifier_mlp(x2, params))
    ref2 = _reference(x2, params)
    assert out2.shape == (class_dim, 17, 19)
    assert jnp.allclose(out2, ref2, atol=1e-5, rtol=1e-5)

    # Case 3: bf16 MXU-input path (v6e/v7x), f32 accumulation, looser tol.
    out3 = jax.block_until_ready(classifier_mlp(x, params, use_bf16=True))
    assert jnp.allclose(out3, ref, atol=3e-2, rtol=3e-2)

    print("KERNEL_OK")
</pallas_src>

<mosaic_0001>
module attributes {stable_mosaic.version = 11 : i64} {
  func.func @kernel(%arg0: i32, %arg1: memref<4x128xf32, #tpu.memory_space<vmem>>, %arg2: memref<32x4xf32, #tpu.memory_space<vmem>>, %arg3: memref<32x1xf32, #tpu.memory_space<vmem>>, %arg4: memref<64x32xf32, #tpu.memory_space<vmem>>, %arg5: memref<64x1xf32, #tpu.memory_space<vmem>>, %arg6: memref<8x64xf32, #tpu.memory_space<vmem>>, %arg7: memref<8x1xf32, #tpu.memory_space<vmem>>, %arg8: memref<8x128xf32, #tpu.memory_space<vmem>>) attributes {dimension_semantics = [#tpu.dimension_semantics<parallel>], iteration_bounds = array<i64: 2>, scalar_prefetch = 0 : i64, scratch_operands = 0 : i64, tpu.core_type = #tpu.core_type<tc>, window_params = [{transform_indices = @transform_0, window_bounds = array<i64: 4, 128>}, {pipeline_mode = #tpu.pipeline_mode<synchronous>, transform_indices = @transform_1, window_bounds = array<i64: 32, 4>}, {pipeline_mode = #tpu.pipeline_mode<synchronous>, transform_indices = @transform_2, window_bounds = array<i64: 32, 1>}, {pipeline_mode = #tpu.pipeline_mode<synchronous>, transform_indices = @transform_3, window_bounds = array<i64: 64, 32>}, {pipeline_mode = #tpu.pipeline_mode<synchronous>, transform_indices = @transform_4, window_bounds = array<i64: 64, 1>}, {pipeline_mode = #tpu.pipeline_mode<synchronous>, transform_indices = @transform_5, window_bounds = array<i64: 8, 64>}, {pipeline_mode = #tpu.pipeline_mode<synchronous>, transform_indices = @transform_6, window_bounds = array<i64: 8, 1>}, {transform_indices = @transform_7, window_bounds = array<i64: 8, 128>}]} {
    %c0 = arith.constant 0 : index
    %c0_0 = arith.constant 0 : index
    %0 = vector.load %arg2[%c0, %c0_0] : memref<32x4xf32, #tpu.memory_space<vmem>>, vector<32x4xf32>
    %c0_1 = arith.constant 0 : index
    %c0_2 = arith.constant 0 : index
    %1 = vector.load %arg3[%c0_1, %c0_2] : memref<32x1xf32, #tpu.memory_space<vmem>>, vector<32x1xf32>
    %c0_3 = arith.constant 0 : index
    %c0_4 = arith.constant 0 : index
    %2 = vector.load %arg4[%c0_3, %c0_4] : memref<64x32xf32, #tpu.memory_space<vmem>>, vector<64x32xf32>
    %c0_5 = arith.constant 0 : index
    %c0_6 = arith.constant 0 : index
    %3 = vector.load %arg5[%c0_5, %c0_6] : memref<64x1xf32, #tpu.memory_space<vmem>>, vector<64x1xf32>
    %c0_7 = arith.constant 0 : index
    %c0_8 = arith.constant 0 : index
    %4 = vector.load %arg6[%c0_7, %c0_8] : memref<8x64xf32, #tpu.memory_space<vmem>>, vector<8x64xf32>
    %c0_9 = arith.constant 0 : index
    %c0_10 = arith.constant 0 : index
    %5 = vector.load %arg7[%c0_9, %c0_10] : memref<8x1xf32, #tpu.memory_space<vmem>>, vector<8x1xf32>
    %c0_11 = arith.constant 0 : index
    %c0_12 = arith.constant 0 : index
    %6 = vector.load %arg1[%c0_11, %c0_12] : memref<4x128xf32, #tpu.memory_space<vmem>>, vector<4x128xf32>
    %cst = arith.constant dense<0.000000e+00> : vector<32x128xf32>
    %7 = tpu.matmul %0, %6, %cst {dimension_numbers = #tpu.dot_dimension_numbers<[1], [0], [0], [1], [0, 0, 1, 1], [], []>} : vector<32x4xf32>, vector<4x128xf32>, vector<32x128xf32> -> vector<32x128xf32>
    %8 = vector.broadcast %1 : vector<32x1xf32> to vector<32x128xf32>
    %9 = arith.addf %7, %8 : vector<32x128xf32>
    %cst_13 = arith.constant 0.000000e+00 : f32
    %10 = vector.broadcast %cst_13 : f32 to vector<32x128xf32>
    %11 = arith.maximumf %9, %10 : vector<32x128xf32>
    %cst_14 = arith.constant dense<0.000000e+00> : vector<64x128xf32>
    %12 = tpu.matmul %2, %11, %cst_14 {dimension_numbers = #tpu.dot_dimension_numbers<[1], [0], [0], [1], [0, 0, 1, 1], [], []>} : vector<64x32xf32>, vector<32x128xf32>, vector<64x128xf32> -> vector<64x128xf32>
    %13 = vector.broadcast %3 : vector<64x1xf32> to vector<64x128xf32>
    %14 = arith.addf %12, %13 : vector<64x128xf32>
    %cst_15 = arith.constant 0.000000e+00 : f32
    %15 = vector.broadcast %cst_15 : f32 to vector<64x128xf32>
    %16 = arith.maximumf %14, %15 : vector<64x128xf32>
    %cst_16 = arith.constant dense<0.000000e+00> : vector<8x128xf32>
    %17 = tpu.matmul %4, %16, %cst_16 {dimension_numbers = #tpu.dot_dimension_numbers<[1], [0], [0], [1], [0, 0, 1, 1], [], []>} : vector<8x64xf32>, vector<64x128xf32>, vector<8x128xf32> -> vector<8x128xf32>
    %18 = vector.broadcast %5 : vector<8x1xf32> to vector<8x128xf32>
    %19 = arith.addf %17, %18 : vector<8x128xf32>
    %c0_17 = arith.constant 0 : index
    %c0_18 = arith.constant 0 : index
    %20 = vector.load %arg8[%c0_17, %c0_18] : memref<8x128xf32, #tpu.memory_space<vmem>>, vector<8x128xf32>
    tpu.vector_store %arg8[%c0_17, %c0_18], %19 {strides = array<i32>} : memref<8x128xf32, #tpu.memory_space<vmem>>, vector<8x128xf32>,
    return
  }
  func.func @transform_0(%arg0: i32) -> (i32, i32) {
    %c0_i32 = arith.constant 0 : i32
    %c0_i32_0 = arith.constant 0 : i32
    return %c0_i32, %arg0 : i32, i32
  }
  func.func @transform_1(%arg0: i32) -> (i32, i32) {
    %c0_i32 = arith.constant 0 : i32
    %c0_i32_0 = arith.constant 0 : i32
    %c0_i32_1 = arith.constant 0 : i32
    return %c0_i32, %c0_i32_0 : i32, i32
  }
  func.func @transform_2(%arg0: i32) -> (i32, i32) {
    %c0_i32 = arith.constant 0 : i32
    %c0_i32_0 = arith.constant 0 : i32
    %c0_i32_1 = arith.constant 0 : i32
    return %c0_i32, %c0_i32_0 : i32, i32
  }
  func.func @transform_3(%arg0: i32) -> (i32, i32) {
    %c0_i32 = arith.constant 0 : i32
    %c0_i32_0 = arith.constant 0 : i32
    %c0_i32_1 = arith.constant 0 : i32
    return %c0_i32, %c0_i32_0 : i32, i32
  }
  func.func @transform_4(%arg0: i32) -> (i32, i32) {
    %c0_i32 = arith.constant 0 : i32
    %c0_i32_0 = arith.constant 0 : i32
    %c0_i32_1 = arith.constant 0 : i32
    return %c0_i32, %c0_i32_0 : i32, i32
  }
  func.func @transform_5(%arg0: i32) -> (i32, i32) {
    %c0_i32 = arith.constant 0 : i32
    %c0_i32_0 = arith.constant 0 : i32
    %c0_i32_1 = arith.constant 0 : i32
    return %c0_i32, %c0_i32_0 : i32, i32
  }
  func.func @transform_6(%arg0: i32) -> (i32, i32) {
    %c0_i32 = arith.constant 0 : i32
    %c0_i32_0 = arith.constant 0 : i32
    %c0_i32_1 = arith.constant 0 : i32
    return %c0_i32, %c0_i32_0 : i32, i32
  }
  func.func @transform_7(%arg0: i32) -> (i32, i32) {
    %c0_i32 = arith.constant 0 : i32
    %c0_i32_0 = arith.constant 0 : i32
    return %c0_i32, %arg0 : i32, i32
  }
}

</mosaic_0001>

<bundles_post_ra>
// kernel: tpu_custom_call.1
= control target key start
LH: loop header
LB: loop body
LE: loop exit
PB: predicated region body
PF: predicated region fallthrough
CT: control target
= control target key end

     0   :  { %12 = vsyncpa [#allocation3], 0  ;;  %s1219_s0 = inlined_call_operand.vmem [shape: f32[4,256], index: 0, kind: input, shape index: {}]   ;;  %s1220_s1 = inlined_call_operand.vmem [shape: f32[32,4], index: 1, kind: input, shape index: {}]   ;;  %s1221_s2 = inlined_call_operand.vmem [shape: f32[32,1], index: 2, kind: input, shape index: {}]   ;;  %s1222_s3 = inlined_call_operand.vmem [shape: f32[64,32], index: 3, kind: input, shape index: {}]   ;;  %s1223_s4 = inlined_call_operand.vmem [shape: f32[64,1], index: 4, kind: input, shape index: {}]   ;;  %s1224_s5 = inlined_call_operand.vmem [shape: f32[8,64], index: 5, kind: input, shape index: {}]   ;;  %s1225_s6 = inlined_call_operand.vmem [shape: f32[8,1], index: 6, kind: input, shape index: {}]   ;;  %s1226_s7 = inlined_call_operand.hbm [shape: f32[8,256], index: 7, kind: output, shape index: {}]  }
   0x1   :  { %14 = vsyncpa [#allocation3 + $0x1], 0  ;;  %s1029_s24 = smov 0   ;;  %s1031_s25 = smov 0  }
   0x2   :  { %s1033_s26 = smov 0   ;;  %s1035_s27 = smov 0  }
   0x3 LB: > { %s1050_s28 = sadd.s32 4294967295, %s982_s27   ;;  %s758_s29 = sadd.s32 4294967294, %s982_s27   ;;  %s982_s27 = sphi %s1035_s27, %s1232_s27   ;;  %s978_s26 = sphi %s1033_s26, %s1231_s26   ;;  %s974_s25 = sphi %s1031_s25, %s1230_s25   ;;  %s970_s24 = sphi %s1029_s24, %s1229_s24  }
   0x4   : > { %s1054_s30 = sadd.s32 1, %s982_s27   ;;  %s179_s8 = sadd.s32 1, %s978_s26 }
   0x5   : > { %s176_s9 = ssub.s32 %s982_s27, %s1054_s30  ;;  %p189_p0 = scmp.ne.s32.totalorder %s978_s26, %s974_s25 }
   0x6   : > { %p177_p1 = scmp.eq.s32.totalorder %s176_s9, 0  ;;  %p190_p2 = scmp.eq.s32.totalorder %s1050_s28, 1 }
   0x7   : > { %p195_p3 = scmp.ne.s32.totalorder %s974_s25, %s970_s24  ;;  %p196_p4 = scmp.eq.s32.totalorder %s758_s29, 1 }
   0x8   : > { %s1065_s10 = scalar_select %p177_p1, %s978_s26, %s179_s8  }
   0x9   : > { %p1067_p5 = por %p190_p2, %p189_p0  ;;  %p1071_p6 = por %p196_p4, %p195_p3 }
   0xa   : > { %p761_p7 = scmp.ge.s32.totalorder %s982_s27, 1  ;;  %p239_p8 = scmp.lt.s32.totalorder %s982_s27, 3 }
   0xc   : > { %p240_p9 = pnand %p761_p7, %p239_p8 }
   0xd   : > { %p270_p10 = scmp.lt.s32.totalorder (!%p240_p9), %s1050_s28, 1  ;;  %v274_v0 = vld [vmem:[%s1220_s1] sm:$0xff] (!%p240_p9)  ;;  %vm321_vm0 = vcmask (!%p240_p9), 31744   ;;  %v984_v2 = vmov (!%p240_p9), 0   ;;  %v280_v3 = vld [vmem:[%s1221_s2 + $0x10] sm:$0xff] (!%p240_p9)  ;;  %vm334_vm1 = vcmask (!%p240_p9), 1043456  }
   0xe   : > { %243 = sbr.rel (%p240_p9) target bundleno = 717 (0x2cd), region = 48  ;;  %810 = vmatprep.mubr.msk.f32.mxu0 (!%p240_p9), %vm321_vm0, %v274_v0  ;;  %v278_v1 = vld [vmem:[%s1221_s2] sm:$0xff] (!%p240_p9)  ;;  %918 = vset.pattern.permute.xlu0 (!%p240_p9), %v984_v2  ;;  %v279_v4 = vld [vmem:[%s1221_s2 + $0x8] sm:$0xff] (!%p240_p9)  ;;  %v281_v5 = vld [vmem:[%s1221_s2 + $0x18] sm:$0xff] (!%p240_p9)  ;;  %vm467_vm2 = vcmask (!%p240_p9), 261120   ;;  %v985_v45 = vmov (!%p240_p9), 0.0|0.0  }
   0xf   : > { %919 = vset.pattern.permute.xlu1 (!%p240_p9), %v984_v2  ;;  %303 = vperm.xlu0 (!%p240_p9), %918, %v278_v1   ;;  %v275_v7 = vld [vmem:[%s1220_s1 + $0x8] sm:$0xff] (!%p240_p9)  ;;  %v276_v8 = vld [vmem:[%s1220_s1 + $0x10] sm:$0xff] (!%p240_p9)  ;;  %v290_v9 = vld [vmem:[%s1223_s4] sm:$0xff] (!%p240_p9)  ;;  %vm986_vm3 = vmmov (!%p240_p9), 0   ;;  %v987_v46 = vmov (!%p240_p9), 0.0   ;;  %vm610_vm4 = vcmask (!%p240_p9), 523264  }
  0x10   : > { %313 = vperm.xlu1 (!%p240_p9), %919, %v280_v3   ;;  %v291_v10 = vld [vmem:[%s1223_s4 + $0x8] sm:$0xff] (!%p240_p9)  ;;  %v277_v11 = vld [vmem:[%s1220_s1 + $0x18] sm:$0xff] (!%p240_p9)  ;;  %v292_v12 = vld [vmem:[%s1223_s4 + $0x10] sm:$0xff] (!%p240_p9)  ;;  %s267_s14 = sand.u32 (!%p240_p9), 1, %s974_s25   ;;  %s779_s16 = sshll.u32 (!%p240_p9), %s1050_s28, 7 }
  0x11   : > { %v293_v13 = vld [vmem:[%s1223_s4 + $0x18] sm:$0xff] (!%p240_p9)  ;;  %v294_v14 = vld [vmem:[%s1223_s4 + $0x20] sm:$0xff] (!%p240_p9)  ;;  %v295_v15 = vld [vmem:[%s1223_s4 + $0x28] sm:$0xff] (!%p240_p9)  ;;  %s762_s15 = sshll.u32 (!%p240_p9), %s267_s14, 3  ;;  %s1177_s21 = scalar_lea.hbm (!%p240_p9), %s1226_s7, %s779_s16 }
  0x12   : > { %v296_v16 = vld [vmem:[%s1223_s4 + $0x30] sm:$0xff] (!%p240_p9)  ;;  %v297_v17 = vld [vmem:[%s1223_s4 + $0x38] sm:$0xff] (!%p240_p9)  ;;  %v299_v18 = vld [vmem:[%s1225_s6] sm:$0xff] (!%p240_p9)  ;;  %s686_s22 = scalar_lea.sflag (!%p240_p9), [#allocation3], %s267_s14 }
  0x13   : > { %308 = vperm.xlu0 (!%p240_p9), %918, %v279_v4   ;;  %v282_v19 = vld [vmem:[%s1222_s3] sm:$0xff] (!%p240_p9)  ;;  %v283_v38 = vld [vmem:[%s1222_s3 + $0x8] sm:$0xff] (!%p240_p9)  ;;  %v284_v39 = vld [vmem:[%s1222_s3 + $0x10] sm:$0xff] (!%p240_p9) }
  0x14   : > { %318 = vperm.xlu1 (!%p240_p9), %919, %v281_v5   ;;  %824 = vmatprep.mubr.msk.f32.mxu1 (!%p240_p9), %vm467_vm2, %v282_v19  ;;  %v285_v40 = vld [vmem:[%s1222_s3 + $0x18] sm:$0xff] (!%p240_p9)  ;;  %v286_v41 = vld [vmem:[%s1222_s3 + $0x20] sm:$0xff] (!%p240_p9)  ;;  %v287_v42 = vld [vmem:[%s1222_s3 + $0x28] sm:$0xff] (!%p240_p9) }
  0x15   : > { %s271_s17 = scalar_select %p270_p10, %s1050_s28, 1  ;;  %v288_v43 = vld [vmem:[%s1222_s3 + $0x30] sm:$0xff]  ;;  %v289_v44 = vld [vmem:[%s1222_s3 + $0x38] sm:$0xff]  ;;  %v298_v19 = vld [vmem:[%s1224_s5] sm:$0xff] }
  0x16   : > { %s988_s28 = smov [#allocation2]  }
  0x17   : > { %s763_s20 = sshll.u32 %s271_s17, 2  ;;  %429 = vperm.xlu0 %918, %v290_v9   ;;  %s269_s17 = scalar_lea.vmem [#allocation2], %s762_s15 }
  0x18   : > { %s273_s8 = scalar_lea.vmem %s1219_s0, %s763_s20  ;;  %434 = vperm.xlu1 %919, %v291_v10   ;;  %s699_s18 = sshll.u32 %s269_s17, 4  ;;  %s1179_s18 = int_to_ptr.vmem [resolvable:$true] %s699_s18 }
  0x19   : > { %v300_v6 = vld [vmem:[%s273_s8] sm:$0xf]  ;;  %s920_s23 = scalar_lea.vmem %s1179_s18, 128  ;;  %s924_s29 = sshll.u32 %s988_s28, 4  ;;  %s925_s29 = int_to_ptr.vmem [resolvable:$false] %s924_s29 }
  0x1a   : > { %808 = vmatprep.subr.msk.mxu0 %vm334_vm1, %v300_v6  ;;  %p921_p11 = scmp.ne.s32.totalorder %s1179_s18, %s920_s23  ;;  %s926_s8 = scalar_lea.vmem %s925_s29, 256 }
  0x1b   : > { %809 = vmatpush3.msk.msra.mxu0 %vm334_vm1, %v300_v6  ;;  %439 = vperm.xlu0 %918, %v292_v12   ;;  %p927_p0 = scmp.lt.s32.totalorder %s1179_s18, %s925_s29  ;;  %p928_p1 = scmp.lt.s32.totalorder %s926_s8, %s920_s23 }
  0x1c   : > { %811 = vmatmul.mubr.msk.f32.vlgmr.msra.gmra.mrb[0].mxu0 %vm321_vm0, %v275_v7  ;;  %444 = vperm.xlu1 %919, %v293_v13   ;;  %p922_p12 = pnand %p921_p11, %p1067_p5 }
  0x1d   : > { %813 = vmatprep.mubr.msk.f32.mxu0 %vm321_vm0, %v276_v8  ;;  %863 = vmatprep.subr.bf16.mxu0 %v985_v45  ;;  %p929_p2 = por %p928_p1, %p927_p0 }
  0x1e   : > { %p923_p13 = pneg %p922_p12 }
  0x1f   : > { %449 = vperm.xlu0 %918, %v294_v14  }
  0x20   : > { %814 = vmatmul.mubr.msk.f32.gmra.mrb[2].mxu0 %vm321_vm0, %v277_v11  ;;  %454 = vperm.xlu1 %919, %v295_v15   ;;  %p930_p3 = pnand %p929_p2, %p923_p13 }
  0x21   : > { %852 = vmatprep.mubr.msk.f32.mxu0 %vm986_vm3, %v987_v46 }
  0x23   : > { %459 = vperm.xlu0 %918, %v296_v16  }
  0x24   : > { %464 = vperm.xlu1 %919, %v297_v17  }
  0x27   : > { %607 = vperm.xlu0 %918, %v299_v18  }
  0x8e   : > { %v304_v20 = vpop.permute.xlu0 %303 }
  0x8f   : > { %v314_v21 = vpop.permute.xlu1 %313 }
  0x92   : > { %v309_v22 = vpop.permute.xlu0 %308 }
  0x93   : > { %v319_v28 = vpop.permute.xlu1 %318 }
  0x96   : > { %v430_v48 = vpop.permute.xlu0 %429 }
  0x97   : > { %v435_v47 = vpop.permute.xlu1 %434 }
  0x9a   : > { %v440_v51 = vpop.permute.xlu0 %439 }
  0x9b   : > { %v445_v49 = vpop.permute.xlu1 %444 }
  0x9e   : > { %v450_v63 = vpop.permute.xlu0 %449 }
  0x9f   : > { %v455_v60 = vpop.permute.xlu1 %454 }
  0xa2   : > { %v460_v11 = vpop.permute.xlu0 %459 }
  0xa3   : > { %v465_v8 = vpop.permute.xlu1 %464 }
  0xef   : > { %v812_v23 = vpop.f32.mrb[0].mxu0 }
  0xf0   : > { %v410_v24 = vadd.f32 %v812_v23, %v309_v22  ;;  %v404_v25 = vpop.f32.mrb[1].mxu0 }
  0xf1   : > { %v405_v26 = vadd.f32 %v404_v25, %v304_v20  ;;  %v608_v20 = vpop.permute.xlu0 %607 }
  0xf2   : > { %v424_v27 = vmax.f32 %v410_v24, 0.0 }
  0xf3   : > { %v423_v29 = vmax.f32 %v405_v26, 0.0  ;;  %v815_v30 = vpop.f32.mrb[2].mxu0 }
  0xf4   : > { %v420_v31 = vadd.f32 %v815_v30, %v319_v28  ;;  %v414_v32 = vpop.f32.mrb[3].mxu0 }
  0xf5   : > { %v415_v33 = vadd.f32 %v414_v32, %v314_v21  ;;  %v855_v34 = vpack.c.bf16 %v424_v27, %v423_v29 }
  0xf6   : > { %v426_v35 = vmax.f32 %v420_v31, 0.0 }
  0xf7   : > { %v425_v36 = vmax.f32 %v415_v33, 0.0  ;;  %856 = vmatprep.subr.bf16.mxu1 %v855_v34 }
  0xf8   : > { %858 = vmatpush3.bf16.msra.mxu1 %v855_v34 }
  0xf9   : > { %v859_v37 = vpack.c.bf16 %v426_v35, %v425_v36 }
  0xfb   : > { %860 = vmatprep.subr.bf16.mxu1 %v859_v37 }
  0xfc   : > { %862 = vmatpush3.bf16.msra.mxu1 %v859_v37 }
  0xff   : > { %825 = vmatmul.mubr.msk.f32.vlgmr.msra.gmra.mrb[0].mxu1 %vm467_vm2, %v283_v38 }
 0x100   : > { %827 = vmatprep.mubr.msk.f32.mxu1 %vm467_vm2, %v284_v39 }
 0x103   : > { %828 = vmatmul.mubr.msk.f32.gmra.mrb[2].mxu1 %vm467_vm2, %v285_v40 }
 0x104   : > { %830 = vmatprep.mubr.msk.f32.mxu1 %vm467_vm2, %v286_v41 }
 0x107   : > { %831 = vmatmul.mubr.msk.f32.gmra.mrb[4].mxu1 %vm467_vm2, %v287_v42 }
 0x108   : > { %833 = vmatprep.mubr.msk.f32.mxu1 %vm467_vm2, %v288_v43 }
 0x10b   : > { %834 = vmatmul.mubr.msk.f32.gmra.mrb[6].mxu1 %vm467_vm2, %v289_v44 }
 0x1d2   : > { %v826_v50 = vpop.f32.mrb[0].mxu1 }
 0x1d3   : > { %v564_v52 = vadd.f32 %v826_v50, %v435_v47  ;;  %v558_v53 = vpop.f32.mrb[1].mxu1 }
 0x1d4   : > { %v559_v54 = vadd.f32 %v558_v53, %v430_v48 }
 0x1d5   : > { %v598_v55 = vmax.f32 %v564_v52, 0.0 }
 0x1d6   : > { %v597_v56 = vmax.f32 %v559_v54, 0.0  ;;  %v829_v57 = vpop.f32.mrb[2].mxu1 }
 0x1d7   : > { %v574_v58 = vadd.f32 %v829_v57, %v445_v49  ;;  %v568_v59 = vpop.f32.mrb[3].mxu1 }
 0x1d8   : > { %v864_v61 = vpack.c.bf16 %v598_v55, %v597_v56  ;;  %v569_v62 = vadd.f32 %v568_v59, %v440_v51 }
 0x1d9   : > { %v600_v0 = vmax.f32 %v574_v58, 0.0 }
 0x1da   : > { %v599_v1 = vmax.f32 %v569_v62, 0.0  ;;  %v832_v2 = vpop.f32.mrb[4].mxu1  ;;  %865 = vmatpush3.bf16.msra.mxu0 %v864_v61 }
 0x1db   : > { %v584_v3 = vadd.f32 %v832_v2, %v455_v60  ;;  %v578_v4 = vpop.f32.mrb[5].mxu1  ;;  %866 = vmatprep.subr.bf16.mxu0 %v985_v45 }
 0x1dc   : > { %v867_v5 = vpack.c.bf16 %v600_v0, %v599_v1  ;;  %v579_v6 = vadd.f32 %v578_v4, %v450_v63 }
 0x1dd   : > { %v602_v7 = vmax.f32 %v584_v3, 0.0 }
 0x1de   : > { %v601_v9 = vmax.f32 %v579_v6, 0.0  ;;  %v835_v10 = vpop.f32.mrb[6].mxu1  ;;  %868 = vmatpush3.bf16.msra.mxu0 %v867_v5 }
 0x1df   : > { %v594_v12 = vadd.f32 %v835_v10, %v465_v8  ;;  %v588_v13 = vpop.f32.mrb[7].mxu1  ;;  %869 = vmatprep.subr.bf16.mxu0 %v985_v45 }
 0x1e0   : > { %v870_v14 = vpack.c.bf16 %v602_v7, %v601_v9  ;;  %v589_v15 = vadd.f32 %v588_v13, %v460_v11 }
 0x1e1   : > { %v604_v16 = vmax.f32 %v594_v12, 0.0 }
 0x1e2   : > { %v603_v17 = vmax.f32 %v589_v15, 0.0  ;;  %871 = vmatpush3.bf16.msra.mxu0 %v870_v14 }
 0x1e3   : > { %872 = vmatprep.subr.bf16.mxu0 %v985_v45 }
 0x1e4   : > { %v873_v18 = vpack.c.bf16 %v604_v16, %v603_v17 }
 0x1e6   : > { %874 = vmatpush3.bf16.msra.mxu0 %v873_v18 }
 0x1e9   : > { %853 = vmatmul.mubr.msk.f32.vlgmr.msra.gmra.mrb[4].mxu0 %vm610_vm4, %v298_v19 }
 0x2bc   : > { %v680_v21 = vpop.f32.mrb[4].mxu0 }
 0x2bd   : > { %v681_v22 = vadd.f32 %v680_v21, %v608_v20  ;;  %v854_v23 = vpop.f32.mrb[5].mxu0 }
 0x2bf   : > { %684 = vst [vmem:[%s269_s17] sm:$0xff] %v681_v22 }
 0x2c0   : > { %933 = shalt.err (!%p930_p3)
}
 0x2c1   : > { %s934_s9 = scalar_lea.hbm %s1177_s21, 128  ;;  %s938_s15 = scalar_lea.hbm %s1226_s7, 256 }
 0x2c2   : > { %p935_p4 = scmp.ne.s32.totalorder %s1177_s21, %s934_s9  ;;  %p939_p9 = scmp.lt.u32.totalorder %s1177_s21, %s1226_s7 }
 0x2c3   : > { %p940_p10 = scmp.lt.u32.totalorder %s938_s15, %s934_s9  ;;  %p942_p12 = scmp.lt.u32.totalorder %s934_s9, %s1177_s21 }
 0x2c4   : > { %p936_p7 = pnand %p935_p4, %p1067_p5 }
 0x2c5   : > { %p941_p11 = por %p940_p10, %p939_p9 }
 0x2c6   : > { %p937_p8 = pneg %p936_p7 }
 0x2c7   : > { %p943_p13 = por %p942_p12, %p941_p11 }
 0x2c9   : > { %p944_p0 = pnand %p943_p13, %p937_p8 }
 0x2cb   : > { %947 = shalt.err (!%p944_p0)
}
 0x2cc   : > { %875 = dma.vmem_to_hbm [thread:$0]  (%p1067_p5), %s1179_s18, 128, %s1177_s21, %s686_s22  }
 0x2cd PF: > { %p881_p1 = scmp.ge.s32.totalorder %s982_s27, 2  ;;  %s711_s19 = sand.u32 1, %s970_s24  }
 0x2ce   : > { %s712_s20 = scalar_lea.sflag [#allocation3], %s711_s19 }
 0x2cf   : > { %p878_p2 = pnand %p881_p1, %p1071_p6 }
 0x2d1   : > { %965 = dma.done.wait (!%p878_p2), %s712_s20, 128  }
 0x2d2   : > { %967 = vsyncadd (!%p878_p2), %s712_s20, 4294967168  ;;  %p17_p3 = scmp.ge.s32.totalorder %s1054_s30, 4   ;;  %s1229_s24 = smov %s974_s25 }
 0x2d3   : > { %s1230_s25 = smov %s978_s26  ;;  %s1231_s26 = smov %s1065_s10 }
 0x2d4   : > { %s1232_s27 = smov %s1054_s30  ;;  %19 = sbr.rel (!%p17_p3) target bundleno = 3 (0x3), region = 83 }
 0x2db   :  { %717 = vsyncpa [#allocation3], 1 }
 0x2dc   :  { %719 = vsyncpa [#allocation3 + $0x1], 1 }

</bundles_post_ra>
